<compile_context>
chip_gen: v7x
topology: tpu7x:2x2x1
jax: 0.10.0
libtpu: 0.0.40
codegen_flags: <defaults>
</compile_context>

<pallas_src>
import functools
import math

import jax
import jax.numpy as jnp
from jax.experimental import pallas as pl
from jax.experimental.pallas import tpu as pltpu

BN_EPS = 1e-5
BN_SCALE = 1.0 / math.sqrt(1.0 + BN_EPS)   # eval-mode BatchNorm, default stats/affine
MXU_DTYPE = jnp.bfloat16                   # MXU operands; accumulation stays f32
ROW_TILE = 512                             # row tile for pointwise-MLP kernels
ATTN_ROW_TILE = 128                        # row tile for the fused kNN-attention kernel
DIST_ROW_TILE = 256                        # row tile for the pairwise-distance kernel
VMEM_LIMIT = 48 * 1024 * 1024              # < v7x 64 MiB physical, > default scoped


def _dot(a, b):
    """MXU matmul: bf16 operands, f32 accumulation."""
    return jnp.dot(a.astype(MXU_DTYPE), b.astype(MXU_DTYPE),
                   preferred_element_type=jnp.float32)


def _row_tile(m, target):
    return m if m <= target else target


def _cparams(n_parallel, n_arbitrary=0):
    sem = ("parallel",) * n_parallel + ("arbitrary",) * n_arbitrary
    return pltpu.CompilerParams(dimension_semantics=sem,
                                vmem_limit_bytes=VMEM_LIMIT)


# ----------------------------- pointwise linear -----------------------------

def _linear_kernel(x_ref, w_ref, b_ref, o_ref, *, act):
    y = _dot(x_ref[...], w_ref[...]) + b_ref[...]
    if act == "relu":
        y = jnp.maximum(y, 0.0)
    o_ref[...] = y.astype(o_ref.dtype)


def linear(x, w, b=None, act="none"):
    """1x1 conv as a row-tiled matmul: (M, Cin) @ (Cin, Cout) + b."""
    M, Cin = x.shape
    Cout = w.shape[1]
    if b is None:
        b = jnp.zeros((Cout,), jnp.float32)
    TM = _row_tile(M, ROW_TILE)
    row = lambda i: (i, 0)
    full = lambda i: (0, 0)
    return pl.pallas_call(
        functools.partial(_linear_kernel, act=act),
        out_shape=jax.ShapeDtypeStruct((M, Cout), jnp.float32),
        grid=(pl.cdiv(M, TM),),
        in_specs=[pl.BlockSpec((TM, Cin), row),
                  pl.BlockSpec((Cin, Cout), full),
                  pl.BlockSpec((1, Cout), full)],
        out_specs=pl.BlockSpec((TM, Cout), row),
        compiler_params=_cparams(1),
    )(x, w, b.reshape(1, Cout))


# ----------------------------- fused 2-layer MLP -----------------------------

def _mlp2_kernel(*refs, in_relu, bn_scale, final_act, out_scale, has_residual):
    if has_residual:
        x_ref, r_ref, w1_ref, b1_ref, w2_ref, b2_ref, o_ref = refs
    else:
        x_ref, w1_ref, b1_ref, w2_ref, b2_ref, o_ref = refs
    x = x_ref[...]
    if in_relu:
        x = jnp.maximum(x, 0.0)
    h = _dot(x, w1_ref[...]) + b1_ref[...]
    if bn_scale is not None:
        h = h * bn_scale
    h = jnp.maximum(h, 0.0)
    y = _dot(h, w2_ref[...]) + b2_ref[...]
    if final_act == "tanh":
        y = jnp.tanh(y)
    if out_scale != 1.0:
        y = y * out_scale
    if has_residual:
        y = y + r_ref[...]
    o_ref[...] = y.astype(o_ref.dtype)


def mlp2(x, w1, b1, w2, b2, *, in_relu=False, bn_scale=None, final_act="none",
         out_scale=1.0, residual=None):
    """Fused MLP_CONV: conv -> (BN) -> relu -> conv (-> tanh -> *scale -> +residual)."""
    M, Cin = x.shape
    Ch = w1.shape[1]
    Cout = w2.shape[1]
    TM = _row_tile(M, ROW_TILE)
    row = lambda i: (i, 0)
    full = lambda i: (0, 0)
    args = [x]
    in_specs = [pl.BlockSpec((TM, Cin), row)]
    if residual is not None:
        args.append(residual)
        in_specs.append(pl.BlockSpec((TM, Cout), row))
    args += [w1, b1.reshape(1, Ch), w2, b2.reshape(1, Cout)]
    in_specs += [pl.BlockSpec((Cin, Ch), full), pl.BlockSpec((1, Ch), full),
                 pl.BlockSpec((Ch, Cout), full), pl.BlockSpec((1, Cout), full)]
    return pl.pallas_call(
        functools.partial(_mlp2_kernel, in_relu=in_relu, bn_scale=bn_scale,
                          final_act=final_act, out_scale=out_scale,
                          has_residual=residual is not None),
        out_shape=jax.ShapeDtypeStruct((M, Cout), jnp.float32),
        grid=(pl.cdiv(M, TM),),
        in_specs=in_specs,
        out_specs=pl.BlockSpec((TM, Cout), row),
        compiler_params=_cparams(1),
    )(*args)


# ------------------- mlp_2 fused with the 3-way channel concat -------------------

def _mlp2_cat3_kernel(x_ref, g1_ref, g2_ref, wa_ref, wb_ref, wc_ref, b1_ref,
                      w2_ref, b2_ref, o_ref):
    h = (_dot(x_ref[0], wa_ref[...]) + _dot(g1_ref[0], wb_ref[...])
         + _dot(g2_ref[0], wc_ref[...]) + b1_ref[...])
    h = jnp.maximum(h, 0.0)
    y = _dot(h, w2_ref[...]) + b2_ref[...]
    o_ref[0] = y.astype(o_ref.dtype)


def mlp2_cat3(x, g1, g2, w1, b1, w2, b2):
    """MLP_CONV on concat([x, broadcast(g1), broadcast(g2)], channel) without
    materializing the concat: the first-layer weight is split into row blocks."""
    B, N, C = x.shape
    C1 = g1.shape[-1]
    C2 = g2.shape[-1]
    Ch = w1.shape[1]
    Cout = w2.shape[1]
    wa, wb, wc = w1[:C], w1[C:C + C1], w1[C + C1:]
    TN = _row_tile(N, ROW_TILE)
    full = lambda b, n: (0, 0)
    return pl.pallas_call(
        _mlp2_cat3_kernel,
        out_shape=jax.ShapeDtypeStruct((B, N, Cout), jnp.float32),
        grid=(B, pl.cdiv(N, TN)),
        in_specs=[pl.BlockSpec((1, TN, C), lambda b, n: (b, n, 0)),
                  pl.BlockSpec((1, 1, C1), lambda b, n: (b, 0, 0)),
                  pl.BlockSpec((1, 1, C2), lambda b, n: (b, 0, 0)),
                  pl.BlockSpec((C, Ch), full), pl.BlockSpec((C1, Ch), full),
                  pl.BlockSpec((C2, Ch), full), pl.BlockSpec((1, Ch), full),
                  pl.BlockSpec((Ch, Cout), full), pl.BlockSpec((1, Cout), full)],
        out_specs=pl.BlockSpec((1, TN, Cout), lambda b, n: (b, n, 0)),
        compiler_params=_cparams(2),
    )(x, g1, g2, wa, wb, wc, b1.reshape(1, Ch), w2, b2.reshape(1, Cout))


# ------------------------------ fused MLP_Res ------------------------------

def _mlp_res_kernel(x1_ref, x2_ref, w1a_ref, w1b_ref, b1s_ref, w2_ref, b2_ref,
                    o_ref, *, hidden):
    # first layer + shortcut fused into one 2*hidden-wide matmul (fills the MXU)
    hs = _dot(x1_ref[...], w1a_ref[...]) + _dot(x2_ref[...], w1b_ref[...]) + b1s_ref[...]
    h = jnp.maximum(hs[:, :hidden], 0.0)
    y = _dot(h, w2_ref[...]) + b2_ref[...] + hs[:, hidden:]
    o_ref[...] = y.astype(o_ref.dtype)


def mlp_res(x1, x2, w1, b1, w2, b2, ws, bs):
    """MLP_Res on concat([x1, x2], channel): conv2(relu(conv1(x))) + shortcut(x)."""
    M, C1 = x1.shape
    C2 = x2.shape[1]
    Hd = w1.shape[1]
    Cout = w2.shape[1]
    w1s = jnp.concatenate([w1, ws], axis=1)                 # (C1+C2, Hd+Cout)
    b1s = jnp.concatenate([b1, bs], axis=0).reshape(1, Hd + Cout)
    w1a, w1b = w1s[:C1], w1s[C1:]
    TM = _row_tile(M, ROW_TILE)
    row = lambda i: (i, 0)
    full = lambda i: (0, 0)
    return pl.pallas_call(
        functools.partial(_mlp_res_kernel, hidden=Hd),
        out_shape=jax.ShapeDtypeStruct((M, Cout), jnp.float32),
        grid=(pl.cdiv(M, TM),),
        in_specs=[pl.BlockSpec((TM, C1), row), pl.BlockSpec((TM, C2), row),
                  pl.BlockSpec((C1, Hd + Cout), full),
                  pl.BlockSpec((C2, Hd + Cout), full),
                  pl.BlockSpec((1, Hd + Cout), full),
                  pl.BlockSpec((Hd, Cout), full), pl.BlockSpec((1, Cout), full)],
        out_specs=pl.BlockSpec((TM, Cout), row),
        compiler_params=_cparams(1),
    )(x1, x2, w1a, w1b, b1s, w2, b2.reshape(1, Cout))


# ------------------------------ global max pool ------------------------------

def _maxpool_kernel(x_ref, o_ref):
    @pl.when(pl.program_id(0) == 0)
    def _():
        o_ref[...] = jnp.full_like(o_ref, -jnp.inf)
    o_ref[...] = jnp.maximum(o_ref[...], jnp.max(x_ref[...], axis=1))


def max_over_points(x):
    """x: (B, N, C) -> (B, C), streaming max over the point axis."""
    B, N, C = x.shape
    TN = _row_tile(N, ROW_TILE)
    if N % TN:
        pad = TN - N % TN
        x = jnp.concatenate([x, jnp.full((B, pad, C), -jnp.inf, x.dtype)], axis=1)
    return pl.pallas_call(
        _maxpool_kernel,
        out_shape=jax.ShapeDtypeStruct((B, C), x.dtype),
        grid=(x.shape[1] // TN,),
        in_specs=[pl.BlockSpec((B, TN, C), lambda k: (0, k, 0))],
        out_specs=pl.BlockSpec((B, C), lambda k: (0, 0)),
        compiler_params=_cparams(0, 1),
    )(x)


# --------------------------- pairwise squared dist ---------------------------

def _sqdist_kernel(pi_ref, pjt_ref, o_ref):
    pi = pi_ref[0]                                    # (TN, 3)
    pjt = pjt_ref[0]                                  # (3, N)
    cross = jnp.dot(pi, pjt, preferred_element_type=jnp.float32)   # MXU
    ni = jnp.sum(pi * pi, axis=-1, keepdims=True)     # (TN, 1)
    nj = jnp.sum(pjt * pjt, axis=0, keepdims=True)    # (1, N)
    o_ref[0] = ni + nj - 2.0 * cross


def pairwise_sqdist(p, p_t):
    """||pi - pj||^2 = ||pi||^2 + ||pj||^2 - 2 pi.pj, tiled over (batch, row-tile)."""
    B, N, _ = p.shape
    TN = _row_tile(N, DIST_ROW_TILE)
    return pl.pallas_call(
        _sqdist_kernel,
        out_shape=jax.ShapeDtypeStruct((B, N, N), jnp.float32),
        grid=(B, pl.cdiv(N, TN)),
        in_specs=[pl.BlockSpec((1, TN, 3), lambda b, i: (b, i, 0)),
                  pl.BlockSpec((1, 3, N), lambda b, i: (b, 0, 0))],
        out_specs=pl.BlockSpec((1, TN, N), lambda b, i: (b, i, 0)),
        compiler_params=_cparams(2),
    )(p, p_t)


# ----------------------- fused SkipTransformer kernel -----------------------

def _skip_attn_kernel(kin_ref, q_ref, keyg_ref, posrel_ref,
                      wva_ref, wvb_ref, bv1_ref, wv2_ref, bv2_ref,
                      wq_ref, bq_ref, wvp_ref, bvp_ref,
                      wp1_ref, bp1_ref, wp2_ref, bp2_ref,
                      wa1_ref, ba1_ref, wa2_ref, ba2_ref,
                      we_ref, be_ref, o_ref, *, n_knn, v_hidden):
    kin = kin_ref[...]                                # (TA, 128)
    q = q_ref[...]                                    # (TA, 128)

    # mlp_v (MLP_Res on concat([key, query])) — conv1 + shortcut in one matmul.
    hs = _dot(kin, wva_ref[...]) + _dot(q, wvb_ref[...]) + bv1_ref[...]
    h = jnp.maximum(hs[:, :v_hidden], 0.0)
    value = _dot(h, wv2_ref[...]) + bv2_ref[...] + hs[:, v_hidden:]   # (TA, 128)
    identity = value

    query_f = _dot(q, wq_ref[...]) + bq_ref[...]          # (TA, 64)
    value_f = _dot(value, wvp_ref[...]) + bvp_ref[...]    # (TA, 64)

    ta = q.shape[0]
    keyg = keyg_ref[...]                                  # (TA, K, 64)
    pos_rel = posrel_ref[...].reshape(ta * n_knn, 3)      # (TA*K, 3)

    # pos_mlp: conv -> BN(scale) -> relu -> conv
    pe = _dot(pos_rel, wp1_ref[...]) + bp1_ref[...]
    pe = jnp.maximum(pe * BN_SCALE, 0.0)
    pos_emb = _dot(pe, wp2_ref[...]) + bp2_ref[...]       # (TA*K, 64)

    # attn_mlp on (qk_rel + pos_emb)
    qk_rel = (query_f[:, None, :] - keyg).reshape(ta * n_knn, 64)
    ah = _dot(qk_rel + pos_emb, wa1_ref[...]) + ba1_ref[...]
    ah = jnp.maximum(ah * BN_SCALE, 0.0)
    logits = (_dot(ah, wa2_ref[...]) + ba2_ref[...]).reshape(ta, n_knn, 64)

    # softmax over the kNN axis + weighted aggregation (all in f32)
    m = jnp.max(logits, axis=1, keepdims=True)
    e = jnp.exp(logits - m)
    attn = e / jnp.sum(e, axis=1, keepdims=True)
    value_e = value_f[:, None, :] + pos_emb.reshape(ta, n_knn, 64)
    agg = jnp.sum(attn * value_e, axis=1)                 # (TA, 64)

    # conv_end + residual
    y = _dot(agg, we_ref[...]) + be_ref[...]              # (TA, 128)
    o_ref[...] = (y + identity).astype(o_ref.dtype)


def skip_transformer_attn(key_in, Q, key_g, pos_rel, st, n_knn):
    """Whole SkipTransformer core (minus conv_key + kNN gather) in one kernel."""
    B, N, _ = Q.shape
    M = B * N
    TA = _row_tile(M, ATTN_ROW_TILE)

    w1, b1, w2, b2, ws, bs = st["mlp_v"]
    w1s = jnp.concatenate([w1, ws], axis=1)               # (256, 256)
    b1s = jnp.concatenate([b1, bs], axis=0).reshape(1, -1)
    c_half = w1.shape[0] // 2
    wva, wvb = w1s[:c_half], w1s[c_half:]

    wq, bq = st["conv_query"]
    wvp, bvp = st["conv_value"]
    wp1, bp1, wp2, bp2 = st["pos_mlp"]
    wa1, ba1, wa2, ba2 = st["attn_mlp"]
    we, be = st["conv_end"]

    args = (key_in.reshape(M, -1), Q.reshape(M, -1),
            key_g.reshape(M, n_knn, -1), pos_rel.reshape(M, n_knn, 3),
            wva, wvb, b1s, w2, b2.reshape(1, -1),
            wq, bq.reshape(1, -1), wvp, bvp.reshape(1, -1),
            wp1, bp1.reshape(1, -1), wp2, bp2.reshape(1, -1),
            wa1, ba1.reshape(1, -1), wa2, ba2.reshape(1, -1),
            we, be.reshape(1, -1))

    row = lambda i: (i, 0)
    row3 = lambda i: (i, 0, 0)
    in_specs = [pl.BlockSpec((TA, args[0].shape[1]), row),
                pl.BlockSpec((TA, args[1].shape[1]), row),
                pl.BlockSpec((TA, n_knn, args[2].shape[2]), row3),
                pl.BlockSpec((TA, n_knn, 3), row3)]
    for a in args[4:]:
        in_specs.append(pl.BlockSpec(a.shape, lambda i: (0, 0)))

    out = pl.pallas_call(
        functools.partial(_skip_attn_kernel, n_knn=n_knn, v_hidden=w1.shape[1]),
        out_shape=jax.ShapeDtypeStruct((M, w2.shape[1]), jnp.float32),
        grid=(pl.cdiv(M, TA),),
        in_specs=in_specs,
        out_specs=pl.BlockSpec((TA, w2.shape[1]), row),
        compiler_params=_cparams(1),
    )(*args)
    return out.reshape(B, N, -1)


# ----------------------------- parameters -----------------------------

def init_params(key, dim_feat=32, up_factor=2):
    keys = iter(jax.random.split(key, 64))

    def w(cin, cout):
        return jax.random.normal(next(keys), (cin, cout), jnp.float32) / math.sqrt(cin)

    def b(c):
        return jax.random.normal(next(keys), (c,), jnp.float32) * 0.01

    return {
        "mlp_1": (w(3, 64), b(64), w(64, 128), b(128)),
        "mlp_2": (w(128 * 2 + dim_feat, 256), b(256), w(256, 128), b(128)),
        "skip_transformer": {
            "mlp_v": (w(256, 128), b(128), w(128, 128), b(128), w(256, 128), b(128)),
            "conv_key": (w(128, 64), b(64)),
            "conv_query": (w(128, 64), b(64)),
            "conv_value": (w(128, 64), b(64)),
            "pos_mlp": (w(3, 64), b(64), w(64, 64), b(64)),
            "attn_mlp": (w(64, 256), b(256), w(256, 64), b(64)),
            "conv_end": (w(64, 128), b(128)),
        },
        "mlp_ps": (w(128, 64), b(64), w(64, 32), b(32)),
        "ps": jax.random.normal(next(keys), (32, 128, up_factor), jnp.float32) * 0.05,
        "mlp_delta_feature": (w(256, 128), b(128), w(128, 128), b(128), w(256, 128), b(128)),
        "mlp_delta": (w(128, 64), b(64), w(64, 3), b(3)),
    }


# ----------------------------- SPD forward -----------------------------

def spd_forward(params, pcd_prev, feat_global, K_prev=None, *,
                up_factor=2, radius=1, i_step=0, n_knn=16):
    """pcd_prev (B,3,N), feat_global (B,dim_feat,1) -> ((B,3,N*uf), (B,128,N*uf))."""
    B, _, N = pcd_prev.shape
    dim_feat = feat_global.shape[1]
    p = jnp.transpose(pcd_prev, (0, 2, 1))                # (B, N, 3)

    # mlp_1 -> global max pool -> fused concat + mlp_2  => Q
    feat_1 = mlp2(p.reshape(B * N, 3), *params["mlp_1"]).reshape(B, N, 128)
    fmax = max_over_points(feat_1)                        # (B, 128)
    fg = jnp.transpose(feat_global, (0, 2, 1))            # (B, 1, dim_feat)
    Q = mlp2_cat3(feat_1, fmax.reshape(B, 1, 128), fg, *params["mlp_2"])   # (B, N, 128)

    key_in = Q if K_prev is None else jnp.transpose(K_prev, (0, 2, 1))

    # ---------------- SkipTransformer ----------------
    st = params["skip_transformer"]
    key_f = linear(key_in.reshape(B * N, 128), *st["conv_key"]).reshape(B, N, 64)

    # kNN: squared distances on the MXU; top-k selection + gather are index plumbing.
    dist = pairwise_sqdist(p, pcd_prev)                   # (B, N, N)
    _, idx = jax.lax.top_k(-dist, n_knn)                  # (B, N, K)
    # TODO(synk): move this gather into the fused attention kernel via scalar-prefetched
    # idx + manual DMA, to avoid materializing the (B,N,K,*) gathered copies in HBM.
    gather = jax.vmap(lambda f, i: f[i])                  # (N,C),(N,K) -> (N,K,C)
    key_g = gather(key_f, idx)                            # (B, N, K, 64)
    pos_rel = p[:, :, None, :] - gather(p, idx)           # (B, N, K, 3)

    # mlp_v + conv_query/value + pos_mlp + attn_mlp + softmax + agg + conv_end + residual
    H = skip_transformer_attn(key_in, Q, key_g, pos_rel, st, n_knn)        # (B, N, 128)
    # --------------------------------------------------

    H_flat = H.reshape(B * N, 128)
    feat_child = mlp2(H_flat, *params["mlp_ps"])          # (B*N, 32)

    # ConvTranspose1d(32, 128, uf, uf, bias=False): pre-transposed weight so the
    # output is already (..., up, 128) channel-last — no post-transpose pass.
    Wps_t = jnp.transpose(params["ps"], (0, 2, 1)).reshape(32, up_factor * 128)
    fc = linear(feat_child, Wps_t).reshape(B, N * up_factor, 128)

    H_up = jnp.repeat(H, up_factor, axis=1)               # nearest upsample (B,N*uf,128)
    Mu = B * N * up_factor
    K_curr = mlp_res(fc.reshape(Mu, 128), H_up.reshape(Mu, 128),
                     *params["mlp_delta_feature"])        # (Mu, 128)

    # mlp_delta fused with relu-in, tanh, 1/radius**i scale and the pcd residual add.
    p_up = jnp.repeat(p, up_factor, axis=1)               # (B, N*uf, 3)
    pcd_child = mlp2(K_curr, *params["mlp_delta"], in_relu=True, final_act="tanh",
                     out_scale=1.0 / (radius ** i_step),
                     residual=p_up.reshape(Mu, 3)).reshape(B, N * up_factor, 3)

    pcd_child_out = jnp.transpose(pcd_child, (0, 2, 1))                    # (B, 3, N*uf)
    K_curr_out = jnp.transpose(K_curr.reshape(B, N * up_factor, 128), (0, 2, 1))
    return pcd_child_out, K_curr_out


# ----------------------------- main -----------------------------

if __name__ == "__main__":
    B, N, DIM_FEAT, UP = 2, 16, 32, 2
    key = jax.random.PRNGKey(0)
    kp, k1, k2 = jax.random.split(key, 3)

    params = init_params(kp, dim_feat=DIM_FEAT, up_factor=UP)
    pcd_prev = jax.random.normal(k1, (B, 3, N), jnp.float32)
    feat_global = jax.random.normal(k2, (B, DIM_FEAT, 1), jnp.float32)

    pcd_child, K_curr = spd_forward(params, pcd_prev, feat_global, K_prev=None,
                                    up_factor=UP, radius=1, i_step=0, n_knn=16)
    jax.block_until_ready((pcd_child, K_curr))

    assert pcd_child.shape == (B, 3, N * UP), pcd_child.shape
    assert K_curr.shape == (B, 128, N * UP), K_curr.shape
    assert bool(jnp.all(jnp.isfinite(pcd_child))) and bool(jnp.all(jnp.isfinite(K_curr)))
    print("KERNEL_OK")
</pallas_src>

<mosaic_0001>
module attributes {stable_mosaic.version = 11 : i64} {
  func.func @_mlp2_kernel(%arg0: i32, %arg1: memref<32x3xf32, #tpu.memory_space<vmem>>, %arg2: memref<3x64xf32, #tpu.memory_space<vmem>>, %arg3: memref<1x64xf32, #tpu.memory_space<vmem>>, %arg4: memref<64x128xf32, #tpu.memory_space<vmem>>, %arg5: memref<1x128xf32, #tpu.memory_space<vmem>>, %arg6: memref<32x128xf32, #tpu.memory_space<vmem>>) attributes {dimension_semantics = [#tpu.dimension_semantics<parallel>], iteration_bounds = array<i64: 1>, scalar_prefetch = 0 : i64, scratch_operands = 0 : i64, tpu.core_type = #tpu.core_type<tc>, window_params = [{transform_indices = @transform_0, window_bounds = array<i64: 32, 3>}, {pipeline_mode = #tpu.pipeline_mode<synchronous>, transform_indices = @transform_1, window_bounds = array<i64: 3, 64>}, {pipeline_mode = #tpu.pipeline_mode<synchronous>, transform_indices = @transform_2, window_bounds = array<i64: 1, 64>}, {pipeline_mode = #tpu.pipeline_mode<synchronous>, transform_indices = @transform_3, window_bounds = array<i64: 64, 128>}, {pipeline_mode = #tpu.pipeline_mode<synchronous>, transform_indices = @transform_4, window_bounds = array<i64: 1, 128>}, {transform_indices = @transform_5, window_bounds = array<i64: 32, 128>}]} {
    %c0 = arith.constant 0 : index
    %c0_0 = arith.constant 0 : index
    %0 = vector.load %arg1[%c0, %c0_0] : memref<32x3xf32, #tpu.memory_space<vmem>>, vector<32x3xf32>
    %c0_1 = arith.constant 0 : index
    %c0_2 = arith.constant 0 : index
    %1 = vector.load %arg2[%c0_1, %c0_2] : memref<3x64xf32, #tpu.memory_space<vmem>>, vector<3x64xf32>
    %2 = arith.truncf %0 : vector<32x3xf32> to vector<32x3xbf16>
    %3 = arith.truncf %1 : vector<3x64xf32> to vector<3x64xbf16>
    %cst = arith.constant dense<0.000000e+00> : vector<32x64xf32>
    %4 = tpu.matmul %2, %3, %cst {dimension_numbers = #tpu.dot_dimension_numbers<[1], [0], [0], [1], [0, 0, 1, 1], [], []>} : vector<32x3xbf16>, vector<3x64xbf16>, vector<32x64xf32> -> vector<32x64xf32>
    %c0_3 = arith.constant 0 : index
    %c0_4 = arith.constant 0 : index
    %5 = vector.load %arg3[%c0_3, %c0_4] : memref<1x64xf32, #tpu.memory_space<vmem>>, vector<1x64xf32>
    %6 = vector.broadcast %5 : vector<1x64xf32> to vector<32x64xf32>
    %7 = arith.addf %4, %6 : vector<32x64xf32>
    %cst_5 = arith.constant 0.000000e+00 : f32
    %8 = vector.broadcast %cst_5 : f32 to vector<32x64xf32>
    %9 = arith.maximumf %7, %8 : vector<32x64xf32>
    %c0_6 = arith.constant 0 : index
    %c0_7 = arith.constant 0 : index
    %10 = vector.load %arg4[%c0_6, %c0_7] : memref<64x128xf32, #tpu.memory_space<vmem>>, vector<64x128xf32>
    %11 = arith.truncf %9 : vector<32x64xf32> to vector<32x64xbf16>
    %12 = arith.truncf %10 : vector<64x128xf32> to vector<64x128xbf16>
    %cst_8 = arith.constant dense<0.000000e+00> : vector<32x128xf32>
    %13 = tpu.matmul %11, %12, %cst_8 {dimension_numbers = #tpu.dot_dimension_numbers<[1], [0], [0], [1], [0, 0, 1, 1], [], []>} : vector<32x64xbf16>, vector<64x128xbf16>, vector<32x128xf32> -> vector<32x128xf32>
    %c0_9 = arith.constant 0 : index
    %c0_10 = arith.constant 0 : index
    %14 = vector.load %arg5[%c0_9, %c0_10] : memref<1x128xf32, #tpu.memory_space<vmem>>, vector<1x128xf32>
    %15 = vector.broadcast %14 : vector<1x128xf32> to vector<32x128xf32>
    %16 = arith.addf %13, %15 : vector<32x128xf32>
    %c0_11 = arith.constant 0 : index
    %c0_12 = arith.constant 0 : index
    %17 = vector.load %arg6[%c0_11, %c0_12] : memref<32x128xf32, #tpu.memory_space<vmem>>, vector<32x128xf32>
    tpu.vector_store %arg6[%c0_11, %c0_12], %16 {strides = array<i32>} : memref<32x128xf32, #tpu.memory_space<vmem>>, vector<32x128xf32>,
    return
  }
  func.func @transform_0(%arg0: i32) -> (i32, i32) {
    %c0_i32 = arith.constant 0 : i32
    %c0_i32_0 = arith.constant 0 : i32
    return %arg0, %c0_i32 : i32, i32
  }
  func.func @transform_1(%arg0: i32) -> (i32, i32) {
    %c0_i32 = arith.constant 0 : i32
    %c0_i32_0 = arith.constant 0 : i32
    %c0_i32_1 = arith.constant 0 : i32
    return %c0_i32, %c0_i32_0 : i32, i32
  }
  func.func @transform_2(%arg0: i32) -> (i32, i32) {
    %c0_i32 = arith.constant 0 : i32
    %c0_i32_0 = arith.constant 0 : i32
    %c0_i32_1 = arith.constant 0 : i32
    return %c0_i32, %c0_i32_0 : i32, i32
  }
  func.func @transform_3(%arg0: i32) -> (i32, i32) {
    %c0_i32 = arith.constant 0 : i32
    %c0_i32_0 = arith.constant 0 : i32
    %c0_i32_1 = arith.constant 0 : i32
    return %c0_i32, %c0_i32_0 : i32, i32
  }
  func.func @transform_4(%arg0: i32) -> (i32, i32) {
    %c0_i32 = arith.constant 0 : i32
    %c0_i32_0 = arith.constant 0 : i32
    %c0_i32_1 = arith.constant 0 : i32
    return %c0_i32, %c0_i32_0 : i32, i32
  }
  func.func @transform_5(%arg0: i32) -> (i32, i32) {
    %c0_i32 = arith.constant 0 : i32
    %c0_i32_0 = arith.constant 0 : i32
    return %arg0, %c0_i32 : i32, i32
  }
}

</mosaic_0001>

<bundles_post_ra>
// kernel: tpu_custom_call.1
= control target key start
LH: loop header
LB: loop body
LE: loop exit
PB: predicated region body
PF: predicated region fallthrough
CT: control target
= control target key end

     0   :  { %10 = vsyncpa [#allocation3], 0  ;;  %s390_s0 = inlined_call_operand.vmem [shape: f32[32,3], index: 0, kind: input, shape index: {}]   ;;  %s391_s1 = inlined_call_operand.vmem [shape: f32[3,64], index: 1, kind: input, shape index: {}]   ;;  %s392_s2 = inlined_call_operand.vmem [shape: f32[1,64], index: 2, kind: input, shape index: {}]   ;;  %s393_s3 = inlined_call_operand.hbm [shape: f32[64,128], index: 3, kind: input, shape index: {}]   ;;  %s394_s4 = inlined_call_operand.vmem [shape: f32[1,128], index: 4, kind: input, shape index: {}]   ;;  %s395_s5 = inlined_call_operand.hbm [shape: f32[32,128], index: 5, kind: output, shape index: {}]  }
   0x1   :  { %11 = vsyncpa [#allocation4], 0  ;;  %s302_s18 = smov [#allocation2]   ;;  %s254_s22 = scalar_lea.hbm %s393_s3, 1024 }
   0x2   :  { %s23_s19 = sshll.u32 %s302_s18, 4  ;;  %p255_p0 = scmp.ne.s32.totalorder %s393_s3, %s254_s22  ;;  %s24_s19 = int_to_ptr.vmem [resolvable:$true] %s23_s19 }
   0x3   :  { %p258_p1 = scmp.lt.u32.totalorder %s254_s22, %s393_s3 }
   0x5   :  { %p260_p2 = pnand %p258_p1, %p255_p0 }
   0x7   :  { %263 = shalt.err (!%p260_p2)
}
   0x8   :  { %s264_s27 = scalar_lea.vmem %s24_s19, 1024  ;;  %p269_p4 = scmp.lt.s32.totalorder %s24_s19, %s24_s19 }
   0x9   :  { %p265_p3 = scmp.ne.s32.totalorder %s24_s19, %s264_s27  ;;  %p270_p5 = scmp.lt.s32.totalorder %s264_s27, %s264_s27 }
   0xb   :  { %p271_p6 = por %p270_p5, %p269_p4 }
   0xd   :  { %p272_p7 = pnand %p271_p6, %p265_p3 }
   0xf   :  { %275 = shalt.err (!%p272_p7)
}
  0x10   :  { %s303_s28 = smov 128   ;;  %s304_s29 = smov 8  }
  0x11   :  { %29 = dma.hbm_to_vmem [thread:$0]  %s393_s3, 1024, %s24_s19, [#allocation3], %s303_s28, %s303_s28, %s304_s29  }
  0x12   :  { %298 = dma.done.wait [#allocation3], 1024  }
  0x13   :  { %299 = vsyncadd [#allocation3], 4294966272  ;;  %vm58_vm0 = vcmask 1040384   ;;  %vm59_vm1 = vcmask 1041408   ;;  %v305_v0 = vmov 65535   ;;  %v36_v4 = vld [vmem:[%s390_s0] sm:$0xff] }
  0x14   :  { %v60_v1 = vsel %vm58_vm0, 4294967295, %v305_v0  ;;  %v40_v2 = vld [vmem:[%s391_s1] sm:$0x7]  ;;  %v37_v5 = vld [vmem:[%s390_s0 + $0x8] sm:$0xff]  ;;  %vm51_vm2 = vcmask 23552   ;;  %v38_v8 = vld [vmem:[%s390_s0 + $0x10] sm:$0xff] }
  0x15   :  { %v61_v3 = vsel %vm59_vm1, %v60_v1, 0  ;;  %v43_v6 = vpack.c.bf16 %v40_v2, %v40_v2  ;;  %v41_v7 = vpack.c.bf16 %v37_v5, %v36_v4  ;;  %v39_v9 = vld [vmem:[%s390_s0 + $0x18] sm:$0xff]  ;;  %v118_v10 = vld [vmem:[#allocation2] sm:$0xff]  ;;  %v119_v11 = vld [vmem:[#allocation2 + $0x8] sm:$0xff]  ;;  %vm139_vm3 = vcmask 523264  }
  0x16   :  { %v120_v12 = vld [vmem:[#allocation2 + $0x10] sm:$0xff]  ;;  %v121_v13 = vld [vmem:[#allocation2 + $0x18] sm:$0xff]  ;;  %v128_v15 = vpack.c.bf16 %v119_v11, %v118_v10  ;;  %v42_v17 = vpack.c.bf16 %v39_v9, %v38_v8  ;;  %v122_v18 = vld [vmem:[#allocation2 + $0x20] sm:$0xff] }
  0x17   :  { %v63_v14 = vand.u32 %v61_v3, %v43_v6  ;;  %233 = vmatprep.mubr.msk.bf16.mxu0 %vm51_vm2, %v41_v7  ;;  %v129_v16 = vpack.c.bf16 %v121_v13, %v120_v12  ;;  %v123_v19 = vld [vmem:[#allocation2 + $0x28] sm:$0xff]  ;;  %v124_v21 = vld [vmem:[#allocation2 + $0x30] sm:$0xff]  ;;  %v125_v22 = vld [vmem:[#allocation2 + $0x38] sm:$0xff] }
  0x18   :  { %237 = vmatprep.subr.bf16.mxu1 %v128_v15  ;;  %v130_v20 = vpack.c.bf16 %v123_v19, %v122_v18  ;;  %v131_v23 = vpack.c.bf16 %v125_v22, %v124_v21  ;;  %v216_v24 = vld [vmem:[%s392_s2] ss:$0 sm:$0xff]  ;;  %s306_s2 = smov [#allocation5]  }
  0x19   :  { %231 = vmatprep.subr.bf16.mxu0 %v63_v14  ;;  %238 = vmatpush3.bf16.msra.mxu1 %v128_v15  ;;  %v219_v39 = vld [vmem:[%s394_s4] ss:$0 sm:$0xff]  ;;  %s204_s18 = sshll.u32 %s306_s2, 4  ;;  %s205_s18 = int_to_ptr.vmem [resolvable:$true] %s204_s18 }
  0x1a   :  { %232 = vmatpush3.bf16.msra.mxu0 %v63_v14  ;;  %239 = vmatprep.subr.bf16.mxu1 %v129_v16  ;;  %s276_s19 = scalar_lea.vmem %s205_s18, 512  ;;  %p281_p9 = scmp.lt.s32.totalorder %s205_s18, %s205_s18 }
  0x1b   :  { %p277_p8 = scmp.ne.s32.totalorder %s205_s18, %s276_s19  ;;  %p282_p10 = scmp.lt.s32.totalorder %s276_s19, %s276_s19 }
  0x1d   :  { %234 = vmatmul.mubr.msk.bf16.vlgmr.msra.gmra.mrb[0].mxu0 %vm51_vm2, %v42_v17  ;;  %240 = vmatpush3.bf16.msra.mxu1 %v129_v16  ;;  %p283_p11 = por %p282_p10, %p281_p9 }
  0x1e   :  { %241 = vmatprep.subr.bf16.mxu1 %v130_v20 }
  0x1f   :  { %p284_p12 = pnand %p283_p11, %p277_p8 }
  0x21   :  { %242 = vmatpush3.bf16.msra.mxu1 %v130_v20 }
  0x22   :  { %243 = vmatprep.subr.bf16.mxu1 %v131_v23 }
  0x25   :  { %244 = vmatpush3.bf16.msra.mxu1 %v131_v23 }
  0xf0   :  { %v235_v25 = vpop.f32.mrb[0].mxu0 }
  0xf1   :  { %v108_v26 = vadd.f32 %v235_v25, %v216_v24  ;;  %v99_v27 = vpop.f32.mrb[1].mxu0 }
  0xf2   :  { %v100_v28 = vadd.f32 %v216_v24, %v99_v27  ;;  %v236_v29 = vpop.f32.mrb[2].mxu0 }
  0xf3   :  { %v111_v30 = vadd.f32 %v236_v29, %v216_v24  ;;  %v102_v31 = vpop.f32.mrb[3].mxu0  ;;  %v116_v33 = vmax.f32 %v108_v26, 0.0 }
  0xf4   :  { %v103_v32 = vadd.f32 %v216_v24, %v102_v31  ;;  %v114_v35 = vmax.f32 %v100_v28, 0.0 }
  0xf5   :  { %v117_v34 = vmax.f32 %v111_v30, 0.0 }
  0xf6   :  { %v115_v36 = vmax.f32 %v103_v32, 0.0 }
  0xf7   :  { %v127_v37 = vpack.c.bf16 %v117_v34, %v116_v33 }
  0xf8   :  { %v126_v38 = vpack.c.bf16 %v115_v36, %v114_v35 }
  0xfa   :  { %245 = vmatprep.mubr.msk.bf16.mxu1 %vm139_vm3, %v126_v38 }
  0xfb   :  { %246 = vmatmul.mubr.msk.bf16.vlgmr.msra.gmra.mrb[0].mxu1 %vm139_vm3, %v127_v37 }
 0x1ce   :  { %v247_v40 = vpop.f32.mrb[0].mxu1 }
 0x1cf   :  { %v189_v41 = vadd.f32 %v247_v40, %v219_v39  ;;  %v180_v42 = vpop.f32.mrb[1].mxu1 }
 0x1d0   :  { %v181_v43 = vadd.f32 %v219_v39, %v180_v42  ;;  %v248_v44 = vpop.f32.mrb[2].mxu1 }
 0x1d1   :  { %197 = vst [vmem:[#allocation5 + $0x10] sm:$0xff] %v189_v41  ;;  %v192_v45 = vadd.f32 %v248_v44, %v219_v39  ;;  %v183_v46 = vpop.f32.mrb[3].mxu1 }
 0x1d2   :  { %195 = vst [vmem:[#allocation5] sm:$0xff] %v181_v43  ;;  %v184_v47 = vadd.f32 %v219_v39, %v183_v46 }
 0x1d3   :  { %198 = vst [vmem:[#allocation5 + $0x18] sm:$0xff] %v192_v45 }
 0x1d4   :  { %196 = vst [vmem:[#allocation5 + $0x8] sm:$0xff] %v184_v47 }
 0x1d5   :  { %287 = shalt.err (!%p284_p12)
}
 0x1d6   :  { %s288_s21 = scalar_lea.hbm %s395_s5, 512 }
 0x1d7   :  { %p289_p13 = scmp.ne.s32.totalorder %s395_s5, %s288_s21  ;;  %p292_p0 = scmp.lt.u32.totalorder %s288_s21, %s395_s5 }
 0x1d9   :  { %p294_p1 = pnand %p292_p0, %p289_p13 }
 0x1db   :  { %297 = shalt.err (!%p294_p1)
}
 0x1dc   :  { %210 = dma.vmem_to_hbm [thread:$0]  %s205_s18, 512, %s395_s5, [#allocation4], %s303_s28, %s303_s28, %s304_s29  }
 0x1dd   :  { %300 = dma.done.wait [#allocation4], 512  }
 0x1de   :  { %301 = vsyncadd [#allocation4], 4294966784 }
 0x1df   :  { %214 = vsyncpa [#allocation3], 1 }
 0x1e0   :  { %215 = vsyncpa [#allocation4], 1 }

</bundles_post_ra>
